<compile_context>
chip_gen: v7x
topology: tpu7x:2x2x1
jax: 0.10.0
libtpu: 0.0.40
codegen_flags: <defaults>
</compile_context>

<pallas_src>
import jax
import jax.numpy as jnp
import numpy as np
from jax.experimental import pallas as pl
from jax.experimental.pallas import tpu as pltpu


def segment_encoder_kernel(img_ref, mask_ref, w_ref, out_ref):
    # img_ref : (Bp, C*HW)  f32   CHW-flattened images (batch padded to 8 rows)
    # mask_ref: (Bp, M, HW) bf16  {0,1} masks per image
    # w_ref   : (C*HW, D)   bf16  synthetic "CLIP" linear projection
    # out_ref : (Bp, D)     f32   mean-over-masks embedding per image
    Bp, M, HW = mask_ref.shape
    CHW = img_ref.shape[1]
    C = CHW // HW
    D = out_ref.shape[1]

    # Sum of the {0,1} masks over M (exact).  f32 VPU path (v5e-safe); on
    # v6e/v7x this reduction could run in bf16 and be cast once afterwards.
    mask_sum = jnp.sum(mask_ref[...].astype(jnp.float32), axis=1)      # (Bp, HW)

    # Per-channel accumulated dots: static lane-aligned slices (c*HW is a
    # multiple of 128) replace the old concat([mask]*C) lane broadcast, so no
    # (Bp, C*HW) temp is materialized.  Masked activation is computed in f32
    # and cast to bf16 only at the MXU boundary; accumulation stays f32.
    acc = jnp.zeros((Bp, D), jnp.float32)
    for c in range(C):                                  # static unroll, C = 4
        lo, hi = c * HW, (c + 1) * HW
        act_c = (img_ref[:, lo:hi] * mask_sum).astype(jnp.bfloat16)    # (Bp, HW)
        acc = acc + jnp.dot(act_c, w_ref[lo:hi, :],
                            preferred_element_type=jnp.float32)        # (Bp, D)

    # Mean fold: one multiply over the tiny (Bp, D) result (kept out of the
    # bf16 weight so arbitrary M stays exact).
    out_ref[...] = acc * (1.0 / M)


def segment_encoder(img_flat, masks, w):
    """img_flat: (Bp, C*HW) f32, masks: (Bp, M, HW) bf16, w: (C*HW, D) bf16.

    Bp must be a multiple of 8 (caller pads); pads are zero rows and produce
    zero embeddings.  Single grid step: at these shapes the kernel is launch-
    and weight-DMA-bound, so there is nothing to pipeline; see header notes
    for the real-CLIP-scale tiling plan.
    """
    Bp, CHW = img_flat.shape
    M, HW = masks.shape[1], masks.shape[2]
    D = w.shape[-1]

    return pl.pallas_call(
        segment_encoder_kernel,
        out_shape=jax.ShapeDtypeStruct((Bp, D), jnp.float32),
        grid_spec=pltpu.PrefetchScalarGridSpec(
            num_scalar_prefetch=0,
            grid=(1,),
            in_specs=[
                pl.BlockSpec((Bp, CHW), lambda i: (0, 0)),
                pl.BlockSpec((Bp, M, HW), lambda i: (0, 0, 0)),
                pl.BlockSpec((CHW, D), lambda i: (0, 0)),
            ],
            out_specs=pl.BlockSpec((Bp, D), lambda i: (0, 0)),
        ),
        compiler_params=pltpu.CompilerParams(
            dimension_semantics=("arbitrary",)),
    )(img_flat, masks, w)


if __name__ == "__main__":
    # Small shapes consistent with the forward pass.
    B, C, H, W = 2, 4, 16, 16
    M = 8          # masks per image (SAM output is data-dependent; fixed here)
    D = 128        # embedding dim of the synthetic image encoder
    HW = H * W
    B_PAD = 8      # pad batch rows to a sublane multiple -> unmasked stores

    key = jax.random.PRNGKey(0)
    k_img, k_mask, k_w = jax.random.split(key, 3)

    # TODO(synk): SAM mask generation has no Pallas equivalent; masks are a
    # synthetic {0,1}-valued input standing in for self.sam_model(img).
    img_tensor = jax.random.normal(k_img, (B, C, H, W), dtype=jnp.float32)
    masks = jax.random.bernoulli(k_mask, 0.3, (B, M, H, W))

    # TODO(synk): the frozen CLIP image encoder is replaced by a deterministic
    # linear projection (bf16 weight below), not a checkpoint load.
    w_bf16 = (jax.random.normal(k_w, (C * HW, D), dtype=jnp.float32)
              * 0.02).astype(jnp.bfloat16)

    # Caller-side layout: CHW flattening, {0,1} masks exact in bf16, batch
    # zero-padded to B_PAD rows (padded rows give zero embeddings, sliced off).
    img_flat = img_tensor.reshape(B, C * HW)
    masks_bf16 = masks.reshape(B, M, HW).astype(jnp.bfloat16)
    pad = B_PAD - B
    img_pad = jnp.pad(img_flat, ((0, pad), (0, 0)))
    masks_pad = jnp.pad(masks_bf16, ((0, pad), (0, 0), (0, 0)))

    emb_pad = segment_encoder(img_pad, masks_pad, w_bf16)
    emb_pad = jax.block_until_ready(emb_pad)
    emb = emb_pad[:B]

    # Pure-JAX f32 reference with the ORIGINAL per-mask semantics:
    #   seg = einsum('chw,mhw->mchw'); emb_rs = encoder(seg); emb = mean over masks
    # (same bf16 weight values; tolerance absorbs the kernel's bf16 activation
    #  rounding on the MXU path).
    masks_f32 = masks.astype(jnp.float32)
    w_f32 = w_bf16.astype(jnp.float32)
    seg = jnp.einsum('bchw,bmhw->bmchw', img_tensor, masks_f32)          # (B,M,C,H,W)
    emb_rs = seg.reshape(B * M, C * HW) @ w_f32                          # (B*M, D)
    ref = emb_rs.reshape(B, M, D).mean(axis=1)                           # (B, D)

    np.testing.assert_allclose(np.asarray(emb), np.asarray(ref),
                               rtol=2e-2, atol=5e-3)
    print("KERNEL_OK")
</pallas_src>

<mosaic_0001>
module attributes {stable_mosaic.version = 11 : i64} {
  func.func @segment_encoder_kernel(%arg0: i32, %arg1: memref<8x1024xf32, #tpu.memory_space<vmem>>, %arg2: memref<8x8x256xbf16, #tpu.memory_space<vmem>>, %arg3: memref<1024x128xbf16, #tpu.memory_space<vmem>>, %arg4: memref<8x128xf32, #tpu.memory_space<vmem>>) attributes {dimension_semantics = [#tpu.dimension_semantics<arbitrary>], iteration_bounds = array<i64: 1>, scalar_prefetch = 0 : i64, scratch_operands = 0 : i64, tpu.core_type = #tpu.core_type<tc>, window_params = [{pipeline_mode = #tpu.pipeline_mode<synchronous>, transform_indices = @transform_0, window_bounds = array<i64: 8, 1024>}, {pipeline_mode = #tpu.pipeline_mode<synchronous>, transform_indices = @transform_1, window_bounds = array<i64: 8, 8, 256>}, {pipeline_mode = #tpu.pipeline_mode<synchronous>, transform_indices = @transform_2, window_bounds = array<i64: 1024, 128>}, {pipeline_mode = #tpu.pipeline_mode<synchronous>, transform_indices = @transform_3, window_bounds = array<i64: 8, 128>}]} {
    %c0 = arith.constant 0 : index
    %c0_0 = arith.constant 0 : index
    %c0_1 = arith.constant 0 : index
    %0 = vector.load %arg2[%c0, %c0_0, %c0_1] : memref<8x8x256xbf16, #tpu.memory_space<vmem>>, vector<8x8x256xbf16>
    %1 = arith.extf %0 : vector<8x8x256xbf16> to vector<8x8x256xf32>
    %cst = arith.constant dense<0.000000e+00> : vector<8x256xf32>
    %2 = vector.multi_reduction <add>, %1, %cst [1] : vector<8x8x256xf32> to vector<8x256xf32>
    %cst_2 = arith.constant 0.000000e+00 : f32
    %3 = vector.broadcast %cst_2 : f32 to vector<8x128xf32>
    %c0_3 = arith.constant 0 : index
    %c0_4 = arith.constant 0 : index
    %4 = vector.load %arg1[%c0_3, %c0_4] : memref<8x1024xf32, #tpu.memory_space<vmem>>, vector<8x256xf32>
    %5 = arith.mulf %4, %2 : vector<8x256xf32>
    %6 = arith.truncf %5 : vector<8x256xf32> to vector<8x256xbf16>
    %c0_5 = arith.constant 0 : index
    %c0_6 = arith.constant 0 : index
    %7 = vector.load %arg3[%c0_5, %c0_6] : memref<1024x128xbf16, #tpu.memory_space<vmem>>, vector<256x128xbf16>
    %cst_7 = arith.constant dense<0.000000e+00> : vector<8x128xf32>
    %8 = tpu.matmul %6, %7, %cst_7 {dimension_numbers = #tpu.dot_dimension_numbers<[1], [0], [0], [1], [0, 0, 1, 1], [], []>} : vector<8x256xbf16>, vector<256x128xbf16>, vector<8x128xf32> -> vector<8x128xf32>
    %9 = arith.addf %3, %8 : vector<8x128xf32>
    %c0_8 = arith.constant 0 : index
    %c256 = arith.constant 256 : index
    %10 = vector.load %arg1[%c0_8, %c256] : memref<8x1024xf32, #tpu.memory_space<vmem>>, vector<8x256xf32>
    %11 = arith.mulf %10, %2 : vector<8x256xf32>
    %12 = arith.truncf %11 : vector<8x256xf32> to vector<8x256xbf16>
    %c256_9 = arith.constant 256 : index
    %c0_10 = arith.constant 0 : index
    %13 = vector.load %arg3[%c256_9, %c0_10] : memref<1024x128xbf16, #tpu.memory_space<vmem>>, vector<256x128xbf16>
    %cst_11 = arith.constant dense<0.000000e+00> : vector<8x128xf32>
    %14 = tpu.matmul %12, %13, %cst_11 {dimension_numbers = #tpu.dot_dimension_numbers<[1], [0], [0], [1], [0, 0, 1, 1], [], []>} : vector<8x256xbf16>, vector<256x128xbf16>, vector<8x128xf32> -> vector<8x128xf32>
    %15 = arith.addf %9, %14 : vector<8x128xf32>
    %c0_12 = arith.constant 0 : index
    %c512 = arith.constant 512 : index
    %16 = vector.load %arg1[%c0_12, %c512] : memref<8x1024xf32, #tpu.memory_space<vmem>>, vector<8x256xf32>
    %17 = arith.mulf %16, %2 : vector<8x256xf32>
    %18 = arith.truncf %17 : vector<8x256xf32> to vector<8x256xbf16>
    %c512_13 = arith.constant 512 : index
    %c0_14 = arith.constant 0 : index
    %19 = vector.load %arg3[%c512_13, %c0_14] : memref<1024x128xbf16, #tpu.memory_space<vmem>>, vector<256x128xbf16>
    %cst_15 = arith.constant dense<0.000000e+00> : vector<8x128xf32>
    %20 = tpu.matmul %18, %19, %cst_15 {dimension_numbers = #tpu.dot_dimension_numbers<[1], [0], [0], [1], [0, 0, 1, 1], [], []>} : vector<8x256xbf16>, vector<256x128xbf16>, vector<8x128xf32> -> vector<8x128xf32>
    %21 = arith.addf %15, %20 : vector<8x128xf32>
    %c0_16 = arith.constant 0 : index
    %c768 = arith.constant 768 : index
    %22 = vector.load %arg1[%c0_16, %c768] : memref<8x1024xf32, #tpu.memory_space<vmem>>, vector<8x256xf32>
    %23 = arith.mulf %22, %2 : vector<8x256xf32>
    %24 = arith.truncf %23 : vector<8x256xf32> to vector<8x256xbf16>
    %c768_17 = arith.constant 768 : index
    %c0_18 = arith.constant 0 : index
    %25 = vector.load %arg3[%c768_17, %c0_18] : memref<1024x128xbf16, #tpu.memory_space<vmem>>, vector<256x128xbf16>
    %cst_19 = arith.constant dense<0.000000e+00> : vector<8x128xf32>
    %26 = tpu.matmul %24, %25, %cst_19 {dimension_numbers = #tpu.dot_dimension_numbers<[1], [0], [0], [1], [0, 0, 1, 1], [], []>} : vector<8x256xbf16>, vector<256x128xbf16>, vector<8x128xf32> -> vector<8x128xf32>
    %27 = arith.addf %21, %26 : vector<8x128xf32>
    %cst_20 = arith.constant 1.250000e-01 : f32
    %28 = vector.broadcast %cst_20 : f32 to vector<8x128xf32>
    %29 = arith.mulf %27, %28 : vector<8x128xf32>
    %c0_21 = arith.constant 0 : index
    %c0_22 = arith.constant 0 : index
    %30 = vector.load %arg4[%c0_21, %c0_22] : memref<8x128xf32, #tpu.memory_space<vmem>>, vector<8x128xf32>
    tpu.vector_store %arg4[%c0_21, %c0_22], %29 {strides = array<i32>} : memref<8x128xf32, #tpu.memory_space<vmem>>, vector<8x128xf32>,
    return
  }
  func.func @transform_0(%arg0: i32) -> (i32, i32) {
    %c0_i32 = arith.constant 0 : i32
    %c0_i32_0 = arith.constant 0 : i32
    %c0_i32_1 = arith.constant 0 : i32
    return %c0_i32, %c0_i32_0 : i32, i32
  }
  func.func @transform_1(%arg0: i32) -> (i32, i32, i32) {
    %c0_i32 = arith.constant 0 : i32
    %c0_i32_0 = arith.constant 0 : i32
    %c0_i32_1 = arith.constant 0 : i32
    %c0_i32_2 = arith.constant 0 : i32
    return %c0_i32, %c0_i32_0, %c0_i32_1 : i32, i32, i32
  }
  func.func @transform_2(%arg0: i32) -> (i32, i32) {
    %c0_i32 = arith.constant 0 : i32
    %c0_i32_0 = arith.constant 0 : i32
    %c0_i32_1 = arith.constant 0 : i32
    return %c0_i32, %c0_i32_0 : i32, i32
  }
  func.func @transform_3(%arg0: i32) -> (i32, i32) {
    %c0_i32 = arith.constant 0 : i32
    %c0_i32_0 = arith.constant 0 : i32
    %c0_i32_1 = arith.constant 0 : i32
    return %c0_i32, %c0_i32_0 : i32, i32
  }
}

</mosaic_0001>

<bundles_post_ra>
// kernel: tpu_custom_call.1
= control target key start
LH: loop header
LB: loop body
LE: loop exit
PB: predicated region body
PF: predicated region fallthrough
CT: control target
= control target key end

     0   :  { %8 = vsyncpa [#allocation3], 0  ;;  %s1408_s0 = inlined_call_operand.hbm [shape: f32[8,1024], index: 0, kind: input, shape index: {}]   ;;  %s1409_s1 = inlined_call_operand.hbm [shape: bf16[8,8,256], index: 1, kind: input, shape index: {}]   ;;  %s1410_s2 = inlined_call_operand.hbm [shape: bf16[1024,128], index: 2, kind: input, shape index: {}]   ;;  %s1411_s3 = inlined_call_operand.hbm [shape: f32[8,128], index: 3, kind: output, shape index: {}]  }
   0x1   :  { %9 = vsyncpa [#allocation6], 0 }
   0x2   :  { %10 = vsyncpa [#allocation4], 0  ;;  %s1248_s12 = smov [#allocation5]   ;;  %s1154_s16 = scalar_lea.hbm %s1409_s1, 1024 }
   0x3   :  { %s26_s13 = sshll.u32 %s1248_s12, 4  ;;  %p1155_p0 = scmp.ne.s32.totalorder %s1409_s1, %s1154_s16  ;;  %s27_s13 = int_to_ptr.vmem [resolvable:$true] %s26_s13 }
   0x4   :  { %p1158_p1 = scmp.lt.u32.totalorder %s1154_s16, %s1409_s1 }
   0x6   :  { %p1160_p2 = pnand %p1158_p1, %p1155_p0 }
   0x8   :  { %1163 = shalt.err (!%p1160_p2)
}
   0x9   :  { %s1164_s21 = scalar_lea.vmem %s27_s13, 1024  ;;  %p1169_p4 = scmp.lt.s32.totalorder %s27_s13, %s27_s13 }
   0xa   :  { %p1165_p3 = scmp.ne.s32.totalorder %s27_s13, %s1164_s21  ;;  %p1170_p5 = scmp.lt.s32.totalorder %s1164_s21, %s1164_s21 }
   0xc   :  { %p1171_p6 = por %p1170_p5, %p1169_p4 }
   0xe   :  { %p1172_p7 = pnand %p1171_p6, %p1165_p3 }
  0x10   :  { %1175 = shalt.err (!%p1172_p7)
}
  0x11   :  { %s1249_s22 = smov 128   ;;  %s1250_s23 = smov 8  }
  0x12   :  { %32 = dma.hbm_to_vmem [thread:$0]  %s1409_s1, 1024, %s27_s13, [#allocation6], %s1249_s22, %s1249_s22, %s1250_s23  }
  0x13   :  { %s1251_s26 = smov [#allocation2]   ;;  %s1252_s28 = smov [#allocation7]  }
  0x14   :  { %s17_s27 = sshll.u32 %s1251_s26, 4  ;;  %s38_s29 = sshll.u32 %s1252_s28, 4  ;;  %s18_s27 = int_to_ptr.vmem [resolvable:$true] %s17_s27  ;;  %s39_s29 = int_to_ptr.vmem [resolvable:$true] %s38_s29 }
  0x15   :  { %s1176_s5 = scalar_lea.hbm %s1408_s0, 1024 }
  0x16   :  { %p1177_p8 = scmp.ne.s32.totalorder %s1408_s0, %s1176_s5  ;;  %p1180_p9 = scmp.lt.u32.totalorder %s1176_s5, %s1408_s0 }
  0x18   :  { %p1182_p10 = pnand %p1180_p9, %p1177_p8 }
  0x1a   :  { %1185 = shalt.err (!%p1182_p10)
}
  0x1b   :  { %s1186_s1 = scalar_lea.vmem %s18_s27, 1024  ;;  %p1191_p12 = scmp.lt.s32.totalorder %s18_s27, %s18_s27 }
  0x1c   :  { %p1187_p11 = scmp.ne.s32.totalorder %s18_s27, %s1186_s1  ;;  %p1192_p13 = scmp.lt.s32.totalorder %s1186_s1, %s1186_s1 }
  0x1e   :  { %p1193_p0 = por %p1192_p13, %p1191_p12 }
  0x20   :  { %p1194_p1 = pnand %p1193_p0, %p1187_p11 }
  0x22   :  { %1197 = shalt.err (!%p1194_p1)
}
  0x23   :  { %20 = dma.hbm_to_vmem [thread:$0]  %s1408_s0, 1024, %s18_s27, [#allocation3]  }
  0x24   :  { %s1198_s14 = scalar_lea.hbm %s1410_s2, 8192 }
  0x25   :  { %p1199_p2 = scmp.ne.s32.totalorder %s1410_s2, %s1198_s14  ;;  %p1202_p3 = scmp.lt.u32.totalorder %s1198_s14, %s1410_s2 }
  0x27   :  { %p1204_p4 = pnand %p1202_p3, %p1199_p2 }
  0x29   :  { %1207 = shalt.err (!%p1204_p4)
}
  0x2a   :  { %s1208_s19 = scalar_lea.vmem %s39_s29, 8192  ;;  %p1213_p6 = scmp.lt.s32.totalorder %s39_s29, %s39_s29 }
  0x2b   :  { %p1209_p5 = scmp.ne.s32.totalorder %s39_s29, %s1208_s19  ;;  %p1214_p7 = scmp.lt.s32.totalorder %s1208_s19, %s1208_s19 }
  0x2d   :  { %p1215_p8 = por %p1214_p7, %p1213_p6 }
  0x2f   :  { %p1216_p9 = pnand %p1215_p8, %p1209_p5 }
  0x31   :  { %1219 = shalt.err (!%p1216_p9)
}
  0x32   :  { %s1253_s0 = smov 64   ;;  %s1254_s20 = smov 4  }
  0x33   :  { %44 = dma.hbm_to_vmem [thread:$0]  %s1410_s2, 8192, %s39_s29, [#allocation6], %s1253_s0, %s1253_s0, %s1254_s20  }
  0x34   :  { %1242 = dma.done.wait [#allocation3], 1024  }
  0x35   :  { %1243 = vsyncadd [#allocation3], 4294966272 }
  0x36   :  { %1244 = dma.done.wait [#allocation6], 9216  }
  0x37   :  { %1245 = vsyncadd [#allocation6], 4294958080  ;;  %v1090_v0 = vld [vmem:[#allocation7 + $0xc0] sm:$0xff]   ;;  %v1094_v4 = vld [vmem:[#allocation7 + $0xc8] sm:$0xff]   ;;  %vm193_vm0 = vcmask 1041409   ;;  %vm195_vm1 = vcmask 1042434  }
  0x38   :  { %v1091_v1 = vld [vmem:[#allocation7 + $0x40] sm:$0xff]   ;;  %994 = vmatprep.subr.bf16.mxu0 %v1090_v0  ;;  %v1095_v5 = vld [vmem:[#allocation7 + $0x48] sm:$0xff]   ;;  %v1098_v8 = vld [vmem:[#allocation7 + $0xd0] sm:$0xff]   ;;  %vm197_vm2 = vcmask 1043459   ;;  %vm199_vm3 = vcmask 1044484   ;;  %vm201_vm4 = vcmask 1045509  }
  0x39   :  { %v1092_v2 = vld [vmem:[#allocation7 + $0x80] sm:$0xff]   ;;  %1016 = vmatprep.subr.bf16.mxu1 %v1091_v1  ;;  %v1096_v6 = vld [vmem:[#allocation7 + $0x88] sm:$0xff]   ;;  %v1099_v9 = vld [vmem:[#allocation7 + $0x50] sm:$0xff]   ;;  %vm203_vm5 = vcmask 1046534   ;;  %vm205_vm6 = vcmask 1047559   ;;  %s1255_s2 = smov [#allocation8]  }
  0x3a   :  { %v1093_v3 = vld [vmem:[#allocation7] sm:$0xff]   ;;  %995 = vmatpush3.bf16.msra.mxu0 %v1092_v2  ;;  %v1097_v7 = vld [vmem:[#allocation7 + $0x8] sm:$0xff]   ;;  %v1100_v10 = vld [vmem:[#allocation7 + $0x90] sm:$0xff]   ;;  %s920_s23 = sshll.u32 %s1255_s2, 4  ;;  %s921_s23 = int_to_ptr.vmem [resolvable:$true] %s920_s23 }
  0x3b   :  { %1017 = vmatpush3.bf16.msra.mxu1 %v1093_v3  ;;  %996 = vmatprep.subr.bf16.mxu0 %v1094_v4  ;;  %v1101_v11 = vld [vmem:[#allocation7 + $0x10] sm:$0xff]   ;;  %v1102_v12 = vld [vmem:[#allocation7 + $0xd8] sm:$0xff]   ;;  %v1106_v16 = vld [vmem:[#allocation7 + $0xe0] sm:$0xff]   ;;  %s1220_s24 = scalar_lea.vmem %s921_s23, 128  ;;  %p1225_p11 = scmp.lt.s32.totalorder %s921_s23, %s921_s23 }
  0x3c   :  { %1018 = vmatprep.subr.bf16.mxu1 %v1095_v5  ;;  %v1103_v13 = vld [vmem:[#allocation7 + $0x58] sm:$0xff]   ;;  %v1107_v17 = vld [vmem:[#allocation7 + $0x60] sm:$0xff]   ;;  %v1110_v20 = vld [vmem:[#allocation7 + $0xe8] sm:$0xff]   ;;  %p1221_p10 = scmp.ne.s32.totalorder %s921_s23, %s1220_s24  ;;  %p1226_p12 = scmp.lt.s32.totalorder %s1220_s24, %s1220_s24 }
  0x3d   :  { %v1104_v14 = vld [vmem:[#allocation7 + $0x98] sm:$0xff]   ;;  %v1108_v18 = vld [vmem:[#allocation7 + $0xa0] sm:$0xff]   ;;  %v1111_v21 = vld [vmem:[#allocation7 + $0x68] sm:$0xff]  }
  0x3e   :  { %997 = vmatpush3.bf16.msra.mxu0 %v1096_v6  ;;  %v1105_v15 = vld [vmem:[#allocation7 + $0x18] sm:$0xff]   ;;  %v1109_v19 = vld [vmem:[#allocation7 + $0x20] sm:$0xff]   ;;  %v1112_v22 = vld [vmem:[#allocation7 + $0xa8] sm:$0xff]   ;;  %p1227_p13 = por %p1226_p12, %p1225_p11 }
  0x3f   :  { %1019 = vmatpush3.bf16.msra.mxu1 %v1097_v7  ;;  %998 = vmatprep.subr.bf16.mxu0 %v1098_v8  ;;  %v1113_v23 = vld [vmem:[#allocation7 + $0x28] sm:$0xff]   ;;  %v1114_v24 = vld [vmem:[#allocation7 + $0xf0] sm:$0xff]   ;;  %v1118_v28 = vld [vmem:[#allocation7 + $0xf8] sm:$0xff]  }
  0x40   :  { %1020 = vmatprep.subr.bf16.mxu1 %v1099_v9  ;;  %v1115_v25 = vld [vmem:[#allocation7 + $0x70] sm:$0xff]   ;;  %v1119_v29 = vld [vmem:[#allocation7 + $0x78] sm:$0xff]   ;;  %v1312_v32 = vld [vmem:[#allocation5] sm:$0xff]  ;;  %p1228_p0 = pnand %p1227_p13, %p1221_p10 }
  0x41   :  { %v1116_v26 = vld [vmem:[#allocation7 + $0xb0] sm:$0xff]   ;;  %v1120_v30 = vld [vmem:[#allocation7 + $0xb8] sm:$0xff]   ;;  %v1314_v33 = vld [vmem:[#allocation5 + $0x8] sm:$0xff]  ;;  %v63_v38 = vunpack.c.l.bf16 %v1312_v32  ;;  %v64_v39 = vunpack.c.h.bf16 %v1312_v32 }
  0x42   :  { %999 = vmatpush3.bf16.msra.mxu0 %v1100_v10  ;;  %v1117_v27 = vld [vmem:[#allocation7 + $0x30] sm:$0xff]   ;;  %v1121_v31 = vld [vmem:[#allocation7 + $0x38] sm:$0xff]   ;;  %v1320_v36 = vld [vmem:[#allocation5 + $0x20] sm:$0xff]  ;;  %v65_v40 = vunpack.c.l.bf16 %v1314_v33  ;;  %v66_v41 = vunpack.c.h.bf16 %v1314_v33 }
  0x43   :  { %1021 = vmatpush3.bf16.msra.mxu1 %v1101_v11  ;;  %1000 = vmatprep.subr.bf16.mxu0 %v1102_v12  ;;  %v1316_v34 = vld [vmem:[#allocation5 + $0x10] sm:$0xff]  ;;  %v1318_v35 = vld [vmem:[#allocation5 + $0x18] sm:$0xff]  ;;  %v1322_v37 = vld [vmem:[#allocation5 + $0x28] sm:$0xff]  ;;  %v71_v48 = vunpack.c.l.bf16 %v1320_v36  ;;  %v72_v49 = vunpack.c.h.bf16 %v1320_v36  ;;  %v85_v57 = vrot.slane %v64_v39, 4 }
  0x44   :  { %1022 = vmatprep.subr.bf16.mxu1 %v1103_v13  ;;  %v1328_v42 = vld [vmem:[#allocation5 + $0x30] sm:$0xff]  ;;  %v1330_v43 = vld [vmem:[#allocation5 + $0x38] sm:$0xff]  ;;  %v67_v44 = vunpack.c.l.bf16 %v1316_v34  ;;  %v68_v45 = vunpack.c.h.bf16 %v1316_v34  ;;  %v69_v46 = vunpack.c.l.bf16 %v1318_v35  ;;  %v70_v47 = vunpack.c.h.bf16 %v1318_v35  ;;  %v1122_v56 = vld [vmem:[#allocation7 + $0x140] sm:$0xff]  }
  0x45   :  { %v73_v50 = vunpack.c.l.bf16 %v1322_v37  ;;  %v74_v51 = vunpack.c.h.bf16 %v1322_v37  ;;  %v75_v52 = vunpack.c.l.bf16 %v1328_v42  ;;  %v76_v53 = vunpack.c.h.bf16 %v1328_v42  ;;  %v1123_v5 = vld [vmem:[#allocation7 + $0x1c0] sm:$0xff]  }
  0x46   :  { %1001 = vmatpush3.bf16.msra.mxu0 %v1104_v14  ;;  %v77_v54 = vunpack.c.l.bf16 %v1330_v43  ;;  %v78_v55 = vunpack.c.h.bf16 %v1330_v43  ;;  %v97_v58 = vrot.slane %v66_v41, 4  ;;  %v109_v59 = vrot.slane %v68_v45, 4  ;;  %v175_v43 = vld [vmem:[#allocation2] sm:$0xff] }
  0x47   :  { %1023 = vmatpush3.bf16.msra.mxu1 %v1105_v15  ;;  %1002 = vmatprep.subr.bf16.mxu0 %v1106_v16  ;;  %v121_v60 = vrot.slane %v70_v47, 4  ;;  %v133_v61 = vrot.slane %v72_v49, 4  ;;  %v145_v62 = vrot.slane %v74_v51, 4  ;;  %v157_v63 = vrot.slane %v76_v53, 4 }
  0x48   :  { %1024 = vmatprep.subr.bf16.mxu1 %v1107_v17  ;;  %v169_v0 = vrot.slane %v78_v55, 4  ;;  %v86_v1 = vadd.f32 %v85_v57, %v64_v39  ;;  %v98_v2 = vadd.f32 %v97_v58, %v66_v41  ;;  %v110_v3 = vadd.f32 %v109_v59, %v68_v45 }
  0x49   :  { %v122_v4 = vadd.f32 %v121_v60, %v70_v47  ;;  %v134_v6 = vadd.f32 %v133_v61, %v72_v49  ;;  %v146_v7 = vadd.f32 %v145_v62, %v74_v51  ;;  %v158_v8 = vadd.f32 %v157_v63, %v76_v53 }
  0x4a   :  { %1003 = vmatpush3.bf16.msra.mxu0 %v1108_v18  ;;  %v170_v9 = vadd.f32 %v169_v0, %v78_v55  ;;  %v87_v10 = vrot.slane %v86_v1, 2  ;;  %v99_v11 = vrot.slane %v98_v2, 2  ;;  %v111_v12 = vrot.slane %v110_v3, 2 }
  0x4b   :  { %1025 = vmatpush3.bf16.msra.mxu1 %v1109_v19  ;;  %1004 = vmatprep.subr.bf16.mxu0 %v1110_v20  ;;  %v123_v13 = vrot.slane %v122_v4, 2  ;;  %v135_v14 = vrot.slane %v134_v6, 2  ;;  %v147_v15 = vrot.slane %v146_v7, 2  ;;  %v159_v16 = vrot.slane %v158_v8, 2 }
  0x4c   :  { %1026 = vmatprep.subr.bf16.mxu1 %v1111_v21  ;;  %v171_v17 = vrot.slane %v170_v9, 2  ;;  %v88_v18 = vadd.f32 %v87_v10, %v86_v1  ;;  %v100_v19 = vadd.f32 %v99_v11, %v98_v2  ;;  %v112_v20 = vadd.f32 %v111_v12, %v110_v3 }
  0x4d   :  { %v124_v21 = vadd.f32 %v123_v13, %v122_v4  ;;  %v79_v59 = vrot.slane %v63_v38, 4  ;;  %v91_v60 = vrot.slane %v65_v40, 4  ;;  %v103_v61 = vrot.slane %v67_v44, 4 }
  0x4e   :  { %1005 = vmatpush3.bf16.msra.mxu0 %v1112_v22  ;;  %v136_v22 = vadd.f32 %v135_v14, %v134_v6  ;;  %v115_v63 = vrot.slane %v69_v46, 4  ;;  %v127_v0 = vrot.slane %v71_v48, 4  ;;  %v139_v1 = vrot.slane %v73_v50, 4 }
  0x4f   :  { %1027 = vmatpush3.bf16.msra.mxu1 %v1113_v23  ;;  %1006 = vmatprep.subr.bf16.mxu0 %v1114_v24  ;;  %v148_v23 = vadd.f32 %v147_v15, %v146_v7  ;;  %v160_v24 = vadd.f32 %v159_v16, %v158_v8  ;;  %v80_v3 = vadd.f32 %v79_v59, %v63_v38  ;;  %v253_v7 = vld [vmem:[#allocation2 + $0x18] sm:$0xff]  ;;  %v176_v38 = vld [vmem:[#allocation2 + $0x8] sm:$0xff] }
  0x50   :  { %1028 = vmatprep.subr.bf16.mxu1 %v1115_v25  ;;  %v172_v25 = vadd.f32 %v171_v17, %v170_v9  ;;  %v92_v4 = vadd.f32 %v91_v60, %v65_v40  ;;  %v116_v8 = vadd.f32 %v115_v63, %v69_v46  ;;  %v128_v9 = vadd.f32 %v127_v0, %v71_v48  ;;  %v563_v0 = vld [vmem:[#allocation2 + $0x28] sm:$0xff] }
  0x51   :  { %v161_v39 = vrot.slane %v160_v24, 1  ;;  %v140_v10 = vadd.f32 %v139_v1, %v73_v50  ;;  %v81_v33 = vrot.slane %v80_v3, 2  ;;  %v738_v1 = vld [vmem:[#allocation2 + $0x38] sm:$0xff] }
  0x52   :  { %1007 = vmatpush3.bf16.msra.mxu0 %v1116_v26  ;;  %v89_v26 = vrot.slane %v88_v18, 1  ;;  %v173_v41 = vrot.slane %v172_v25, 1  ;;  %v93_v40 = vrot.slane %v92_v4, 2  ;;  %v129_v12 = vrot.slane %v128_v9, 2 }
  0x53   :  { %1029 = vmatpush3.bf16.msra.mxu1 %v1117_v27  ;;  %1008 = vmatprep.subr.bf16.mxu0 %v1118_v28  ;;  %v101_v27 = vrot.slane %v100_v19, 1  ;;  %v113_v28 = vrot.slane %v112_v20, 1  ;;  %v141_v13 = vrot.slane %v140_v10, 2  ;;  %v82_v46 = vadd.f32 %v81_v33, %v80_v3 }
  0x54   :  { %1030 = vmatprep.subr.bf16.mxu1 %v1119_v29  ;;  %v125_v29 = vrot.slane %v124_v21, 1  ;;  %v90_v45 = vadd.f32 %v89_v26, %v88_v18  ;;  %v174_v57 = vadd.f32 %v173_v41, %v172_v25  ;;  %v94_v14 = vadd.f32 %v93_v40, %v92_v4  ;;  %v1128_v40 = vld [vmem:[#allocation7 + $0x108] sm:$0xff]  }
  0x55   :  { %v102_v47 = vadd.f32 %v101_v27, %v100_v19  ;;  %v114_v49 = vadd.f32 %v113_v28, %v112_v20  ;;  %v130_v50 = vadd.f32 %v129_v12, %v128_v9  ;;  %v83_v16 = vrot.slane %v82_v46, 1  ;;  %v1132_v12 = vld [vmem:[#allocation7 + $0x110] sm:$0xff]  }
  0x56   :  { %1009 = vmatpush3.bf16.msra.mxu0 %v1120_v30  ;;  %v137_v30 = vrot.slane %v136_v22, 1  ;;  %v126_v51 = vadd.f32 %v125_v29, %v124_v21  ;;  %v95_v17 = vrot.slane %v94_v14, 1  ;;  %v142_v19 = vadd.f32 %v141_v13, %v140_v10  ;;  %v1126_v10 = vld [vmem:[#allocation7 + $0x148] sm:$0xff]   ;;  %v1133_v13 = vld [vmem:[#allocation7 + $0x190] sm:$0xff]  }
  0x57   :  { %1031 = vmatpush3.bf16.msra.mxu1 %v1121_v31  ;;  %1038 = vmatprep.subr.bf16.mxu0 %v1122_v56  ;;  %v149_v31 = vrot.slane %v148_v23, 1  ;;  %v162_v56 = vadd.f32 %v161_v39, %v160_v24  ;;  %v207_v58 = vsel %vm193_vm0, %v102_v47, %v90_v45  ;;  %v84_v24 = vadd.f32 %v83_v16, %v82_v46  ;;  %v1135_v46 = vld [vmem:[#allocation7 + $0x1d8] sm:$0xff]   ;;  %v1142_v16 = vld [vmem:[#allocation7 + $0x168] sm:$0xff]  }
  0x58   :  { %1060 = vmatprep.subr.bf16.mxu1 %v1123_v5  ;;  %v138_v53 = vadd.f32 %v137_v30, %v136_v22  ;;  %v208_v62 = vsel %vm195_vm1, %v114_v49, %v207_v58  ;;  %v104_v5 = vadd.f32 %v103_v61, %v67_v44  ;;  %v117_v44 = vrot.slane %v116_v8, 2 }
  0x59   :  { %v150_v55 = vadd.f32 %v149_v31, %v148_v23  ;;  %v209_v2 = vsel %vm197_vm2, %v126_v51, %v208_v62  ;;  %v131_v23 = vrot.slane %v130_v50, 1  ;;  %v96_v25 = vadd.f32 %v95_v17, %v94_v14  ;;  %v252_v62 = vld [vmem:[#allocation2 + $0x10] sm:$0xff]  ;;  %v1136_v14 = vld [vmem:[#allocation7 + $0x118] sm:$0xff]   ;;  %v1143_v17 = vld [vmem:[#allocation7 + $0x1e8] sm:$0xff]  }
  0x5a   :  { %v210_v6 = vsel %vm199_vm3, %v138_v53, %v209_v2  ;;  %v105_v11 = vrot.slane %v104_v5, 2  ;;  %v118_v37 = vadd.f32 %v117_v44, %v116_v8  ;;  %v143_v28 = vrot.slane %v142_v19, 1  ;;  %v1131_v44 = vld [vmem:[#allocation7 + $0x1d0] sm:$0xff]  }
  0x5b   :  { %v211_v32 = vsel %vm201_vm4, %v150_v55, %v210_v6  ;;  %v151_v29 = vrot.slane %v75_v52, 4  ;;  %v163_v30 = vrot.slane %v77_v54, 4  ;;  %v194_v31 = vsel %vm193_vm0, %v96_v25, %v84_v24  ;;  %v1124_v6 = vld [vmem:[#allocation7 + $0x100] sm:$0xff]   ;;  %v737_v25 = vld [vmem:[#allocation2 + $0x30] sm:$0xff] }
  0x5c   :  { %v212_v34 = vsel %vm203_vm5, %v162_v56, %v211_v32  ;;  %v106_v36 = vadd.f32 %v105_v11, %v104_v5  ;;  %v119_v22 = vrot.slane %v118_v37, 1  ;;  %v132_v39 = vadd.f32 %v131_v23, %v130_v50  ;;  %v1127_v32 = vld [vmem:[#allocation7 + $0x1c8] sm:$0xff]   ;;  %v1141_v50 = vld [vmem:[#allocation7 + $0x1a0] sm:$0xff]   ;;  %v1149_v23 = vld [vmem:[#allocation7 + $0x1b0] sm:$0xff]  }
  0x5d   :  { %v213_v35 = vsel %vm205_vm6, %v174_v57, %v212_v34  ;;  %v152_v41 = vadd.f32 %v151_v29, %v75_v52  ;;  %v164_v45 = vadd.f32 %v163_v30, %v77_v54  ;;  %v144_v55 = vadd.f32 %v143_v28, %v142_v19  ;;  %v1129_v11 = vld [vmem:[#allocation7 + $0x188] sm:$0xff]   ;;  %v1130_v34 = vld [vmem:[#allocation7 + $0x150] sm:$0xff]   ;;  %v562_v24 = vld [vmem:[#allocation2 + $0x20] sm:$0xff] }
  0x5e   :  { %v255_v48 = vmul.f32 %v253_v7, %v213_v35  ;;  %v217_v15 = vmul.f32 %v213_v35, %v176_v38  ;;  %v107_v18 = vrot.slane %v106_v36, 1  ;;  %v120_v27 = vadd.f32 %v119_v22, %v118_v37  ;;  %v1125_v7 = vld [vmem:[#allocation7 + $0x180] sm:$0xff]   ;;  %v1145_v19 = vld [vmem:[#allocation7 + $0x1a8] sm:$0xff]   ;;  %v1148_v22 = vld [vmem:[#allocation7 + $0x130] sm:$0xff]  }
  0x5f   :  { %v153_v51 = vrot.slane %v152_v41, 2  ;;  %v165_v53 = vrot.slane %v164_v45, 2  ;;  %v565_v4 = vmul.f32 %v563_v0, %v213_v35  ;;  %v740_v5 = vmul.f32 %v738_v1, %v213_v35  ;;  %v1134_v35 = vld [vmem:[#allocation7 + $0x158] sm:$0xff]   ;;  %v1140_v37 = vld [vmem:[#allocation7 + $0x120] sm:$0xff]  }
  0x60   :  { %v257_v20 = vpack.c.bf16 %v255_v48, %v255_v48  ;;  %v219_v21 = vpack.c.bf16 %v217_v15, %v217_v15  ;;  %v108_v26 = vadd.f32 %v107_v18, %v106_v36  ;;  %v1137_v36 = vld [vmem:[#allocation7 + $0x198] sm:$0xff]   ;;  %v1138_v48 = vld [vmem:[#allocation7 + $0x160] sm:$0xff]   ;;  %v1144_v18 = vld [vmem:[#allocation7 + $0x128] sm:$0xff]  }
  0x61   :  { %v154_v56 = vadd.f32 %v153_v51, %v152_v41  ;;  %v166_v57 = vadd.f32 %v165_v53, %v164_v45  ;;  %v567_v38 = vpack.c.bf16 %v565_v4, %v565_v4  ;;  %v742_v33 = vpack.c.bf16 %v740_v5, %v740_v5  ;;  %v1139_v15 = vld [vmem:[#allocation7 + $0x1e0] sm:$0xff]   ;;  %v1152_v30 = vld [vmem:[#allocation7 + $0x138] sm:$0xff]  }
  0x62   :  { %418 = vmatprep.mubr.bf16.mxu0 %v257_v20  ;;  %554 = vmatprep.mubr.bf16.mxu1 %v219_v21  ;;  %v196_v47 = vsel %vm195_vm1, %v108_v26, %v194_v31  ;;  %v1146_v20 = vld [vmem:[#allocation7 + $0x170] sm:$0xff]   ;;  %v1150_v26 = vld [vmem:[#allocation7 + $0x178] sm:$0xff]  }
  0x63   :  { %v198_v49 = vsel %vm197_vm2, %v120_v27, %v196_v47  ;;  %v155_v59 = vrot.slane %v154_v56, 1  ;;  %v167_v60 = vrot.slane %v166_v57, 1  ;;  %v1147_v21 = vld [vmem:[#allocation7 + $0x1f0] sm:$0xff]   ;;  %v1151_v27 = vld [vmem:[#allocation7 + $0x1f8] sm:$0xff]  }
  0x64   :  { %v200_v58 = vsel %vm199_vm3, %v132_v39, %v198_v49  ;;  %v1153_v31 = vld [vmem:[#allocation7 + $0x1b8] sm:$0xff]  }
  0x65   :  { %v202_v61 = vsel %vm201_vm4, %v144_v55, %v200_v58  ;;  %v156_v42 = vadd.f32 %v155_v59, %v154_v56  ;;  %v168_v52 = vadd.f32 %v167_v60, %v166_v57 }
  0x67   :  { %v204_v54 = vsel %vm203_vm5, %v156_v42, %v202_v61 }
  0x68   :  { %v1390_v63 = vsel %vm205_vm6, %v168_v52, %v204_v54 }
  0x69   :  { %v254_v2 = vmul.f32 %v252_v62, %v1390_v63  ;;  %v216_v3 = vmul.f32 %v1390_v63, %v175_v43  ;;  %v564_v28 = vmul.f32 %v562_v24, %v1390_v63  ;;  %v739_v29 = vmul.f32 %v737_v25, %v1390_v63 }
  0x6b   :  { %v256_v8 = vpack.c.bf16 %v254_v2, %v254_v2  ;;  %v218_v9 = vpack.c.bf16 %v216_v3, %v216_v3  ;;  %v566_v39 = vpack.c.bf16 %v564_v28, %v564_v28  ;;  %v741_v41 = vpack.c.bf16 %v739_v29, %v739_v29 }
  0x6d   :  { %419 = vmatmul.mubr.bf16.vlgmr.msra.gmra.mrb[0].mxu0 %v256_v8  ;;  %555 = vmatmul.mubr.bf16.vlgmr.msra.gmra.mrb[0].mxu1 %v218_v9 }
  0x6e   :  { %1039 = vmatpush3.bf16.msra.mxu0 %v1124_v6  ;;  %1061 = vmatpush3.bf16.msra.mxu1 %v1125_v7 }
  0x6f   :  { %1040 = vmatprep.subr.bf16.mxu0 %v1126_v10  ;;  %1062 = vmatprep.subr.bf16.mxu1 %v1127_v32 }
  0x70   :  { %728 = vmatprep.mubr.bf16.mxu0 %v567_v38  ;;  %903 = vmatprep.mubr.bf16.mxu1 %v742_v33 }
  0x72   :  { %1041 = vmatpush3.bf16.msra.mxu0 %v1128_v40  ;;  %1063 = vmatpush3.bf16.msra.mxu1 %v1129_v11 }
  0x73   :  { %1042 = vmatprep.subr.bf16.mxu0 %v1130_v34  ;;  %1064 = vmatprep.subr.bf16.mxu1 %v1131_v44 }
  0x76   :  { %1043 = vmatpush3.bf16.msra.mxu0 %v1132_v12  ;;  %1065 = vmatpush3.bf16.msra.mxu1 %v1133_v13 }
  0x77   :  { %1044 = vmatprep.subr.bf16.mxu0 %v1134_v35  ;;  %1066 = vmatprep.subr.bf16.mxu1 %v1135_v46 }
  0x7a   :  { %1045 = vmatpush3.bf16.msra.mxu0 %v1136_v14  ;;  %1067 = vmatpush3.bf16.msra.mxu1 %v1137_v36 }
  0x7b   :  { %1046 = vmatprep.subr.bf16.mxu0 %v1138_v48  ;;  %1068 = vmatprep.subr.bf16.mxu1 %v1139_v15 }
  0x7e   :  { %1047 = vmatpush3.bf16.msra.mxu0 %v1140_v37  ;;  %1069 = vmatpush3.bf16.msra.mxu1 %v1141_v50 }
  0x7f   :  { %1048 = vmatprep.subr.bf16.mxu0 %v1142_v16  ;;  %1070 = vmatprep.subr.bf16.mxu1 %v1143_v17 }
  0x82   :  { %1049 = vmatpush3.bf16.msra.mxu0 %v1144_v18  ;;  %1071 = vmatpush3.bf16.msra.mxu1 %v1145_v19 }
  0x83   :  { %1050 = vmatprep.subr.bf16.mxu0 %v1146_v20  ;;  %1072 = vmatprep.subr.bf16.mxu1 %v1147_v21 }
  0x86   :  { %1051 = vmatpush3.bf16.msra.mxu0 %v1148_v22  ;;  %1073 = vmatpush3.bf16.msra.mxu1 %v1149_v23 }
  0x87   :  { %1052 = vmatprep.subr.bf16.mxu0 %v1150_v26  ;;  %1074 = vmatprep.subr.bf16.mxu1 %v1151_v27 }
  0x8a   :  { %1053 = vmatpush3.bf16.msra.mxu0 %v1152_v30  ;;  %1075 = vmatpush3.bf16.msra.mxu1 %v1153_v31 }
  0x8d   :  { %729 = vmatmul.mubr.bf16.vlgmr.msra.gmra.mrb[4].mxu0 %v566_v39  ;;  %904 = vmatmul.mubr.bf16.vlgmr.msra.gmra.mrb[4].mxu1 %v741_v41 }
 0x140   :  { %v1010_v45 = vpop.f32.mrb[0].mxu0  ;;  %v1032_v47 = vpop.f32.mrb[0].mxu1 }
 0x141   :  { %v1011_v49 = vpop.f32.mrb[1].mxu0  ;;  %v1033_v51 = vpop.f32.mrb[1].mxu1 }
 0x142   :  { %v1012_v53 = vadd.f32 %v1011_v49, %v1010_v45  ;;  %v1034_v55 = vadd.f32 %v1033_v51, %v1032_v47  ;;  %v1013_v56 = vpop.f32.mrb[2].mxu0  ;;  %v1035_v57 = vpop.f32.mrb[2].mxu1 }
 0x143   :  { %v1014_v58 = vpop.f32.mrb[3].mxu0  ;;  %v1036_v59 = vpop.f32.mrb[3].mxu1 }
 0x144   :  { %v557_v60 = vadd.f32 %v1034_v55, %v1012_v53 }
 0x160   :  { %v1054_v61 = vpop.f32.mrb[4].mxu0  ;;  %v1076_v42 = vpop.f32.mrb[4].mxu1 }
 0x161   :  { %v1055_v52 = vpop.f32.mrb[5].mxu0  ;;  %v1077_v62 = vpop.f32.mrb[5].mxu1 }
 0x162   :  { %v1056_v43 = vadd.f32 %v1055_v52, %v1054_v61  ;;  %v1078_v54 = vadd.f32 %v1077_v62, %v1076_v42  ;;  %v1057_v63 = vpop.f32.mrb[6].mxu0  ;;  %v1079_v0 = vpop.f32.mrb[6].mxu1 }
 0x163   :  { %v1058_v1 = vpop.f32.mrb[7].mxu0  ;;  %v1080_v2 = vpop.f32.mrb[7].mxu1 }
 0x164   :  { %v736_v3 = vadd.f32 %v1056_v43, %v557_v60 }
 0x166   :  { %v911_v4 = vadd.f32 %v1078_v54, %v736_v3 }
 0x168   :  { %v912_v5 = vmul.f32 0.125, %v911_v4 }
 0x16a   :  { %913 = vst [vmem:[#allocation8] sm:$0xff] %v912_v5 }
 0x16b   :  { %1231 = shalt.err (!%p1228_p0)
}
 0x16c   :  { %s1232_s27 = scalar_lea.hbm %s1411_s3, 128 }
 0x16d   :  { %p1233_p1 = scmp.ne.s32.totalorder %s1411_s3, %s1232_s27  ;;  %p1236_p2 = scmp.lt.u32.totalorder %s1232_s27, %s1411_s3 }
 0x16f   :  { %p1238_p3 = pnand %p1236_p2, %p1233_p1 }
 0x171   :  { %1241 = shalt.err (!%p1238_p3)
}
 0x172   :  { %923 = dma.vmem_to_hbm [thread:$0]  %s921_s23, 128, %s1411_s3, [#allocation4]  }
 0x173   :  { %1246 = dma.done.wait [#allocation4], 128  }
 0x174   :  { %1247 = vsyncadd [#allocation4], 4294967168 }
 0x175   :  { %927 = vsyncpa [#allocation3], 1 }
 0x176   :  { %928 = vsyncpa [#allocation6], 1 }
 0x177   :  { %929 = vsyncpa [#allocation4], 1 }

</bundles_post_ra>
